<compile_context>
chip_gen: v7x
topology: tpu7x:2x2x1
jax: 0.10.0
libtpu: 0.0.40
codegen_flags: <defaults>
</compile_context>

<pallas_src>
import numpy as np
import jax
import jax.numpy as jnp
from jax import lax
from jax.experimental import pallas as pl
from jax.experimental.pallas import tpu as pltpu


# ------------------------------ Pallas kernel -------------------------------

def fused_cnn_kernel(x_ref, w1_ref, b1_ref, w2_ref, b2_ref, w3_ref, b3_ref,
                     wf_ref, bf_ref, o_ref):
    # x:  [TB, 486] bf16 (PyTorch CHW-flattened input tile)
    # w*: bf16 dense conv-as-matmul weights (BN of previous layer folded in,
    #     N dims zero-padded to lane multiples: 512 / 256 / 128)
    # b*: f32 [1, N] biases (conv bias + folded BN shift, zero-padded)
    # wf: [1, 128] f32 (BN3 + Linear(72,1024) + Linear(1024,1) folded), bf: [1,1]
    x = x_ref[...]
    z1 = jnp.maximum(
        jnp.dot(x, w1_ref[...], preferred_element_type=jnp.float32) + b1_ref[...], 0.0)
    z2 = jnp.maximum(
        jnp.dot(z1.astype(jnp.bfloat16), w2_ref[...],
                preferred_element_type=jnp.float32) + b2_ref[...], 0.0)
    z3 = jnp.maximum(
        jnp.dot(z2.astype(jnp.bfloat16), w3_ref[...],
                preferred_element_type=jnp.float32) + b3_ref[...], 0.0)
    # Folded FC head (72 -> 1): f32 VPU multiply + lane reduce (no 1-wide MXU op).
    o_ref[...] = jnp.sum(z3 * wf_ref[...], axis=-1, keepdims=True) + bf_ref[...]


def _round_up(n, m):
    return (n + m - 1) // m * m


def cnn_forward(x_nchw, kp, *, tile_b=1024):
    """x_nchw: [B, 6, 9, 9] float32 (PyTorch layout). Returns [B, 1] float32."""
    b = x_nchw.shape[0]
    # W1's rows are in CHW order, so a plain (no-copy) reshape suffices.
    # bf16 input: the kernel's MXU operands are bf16 anyway; halves HBM bytes.
    x = x_nchw.reshape(b, -1).astype(jnp.bfloat16)
    k_in = x.shape[1]

    b8 = _round_up(b, 8)
    tb = min(tile_b, b8)                        # batch tile, multiple of 8
    if b8 >= 16:                                # >= 2 grid steps so both v7x TCs run
        tb = min(tb, _round_up(b8 // 2, 8))
    tb = _round_up(tb, 8)
    b_pad = _round_up(b, tb)
    if b_pad != b:
        x = jnp.pad(x, ((0, b_pad - b), (0, 0)))

    def w_spec(a):                              # whole array, VMEM-resident
        return pl.BlockSpec(a.shape, lambda i: (0, 0))

    out = pl.pallas_call(
        fused_cnn_kernel,
        out_shape=jax.ShapeDtypeStruct((b_pad, 1), jnp.float32),
        grid=(b_pad // tb,),
        in_specs=[
            pl.BlockSpec((tb, k_in), lambda i: (i, 0)),
            w_spec(kp["W1"]), w_spec(kp["B1"]),
            w_spec(kp["W2"]), w_spec(kp["B2"]),
            w_spec(kp["W3"]), w_spec(kp["B3"]),
            w_spec(kp["WF"]), w_spec(kp["BF"]),
        ],
        out_specs=pl.BlockSpec((tb, 1), lambda i: (i, 0)),
        compiler_params=pltpu.CompilerParams(
            dimension_semantics=("parallel",),
            vmem_limit_bytes=40 * 1024 * 1024),   # v5e default 16 MiB is tight at tb>=1024
    )(x, kp["W1"], kp["B1"], kp["W2"], kp["B2"], kp["W3"], kp["B3"],
      kp["WF"], kp["BF"])
    return out[:b]


# --------------------------- fold-time construction --------------------------

def _conv_as_dense(w_oihw, h_in, w_in, row_order="hwc"):
    """PyTorch conv weight [Cout, Cin, 3, 3] -> dense matmul weight
    [(h_in*w_in*Cin), (ho*wo*Cout)] for VALID conv, stride 1.
    Rows follow `row_order` flatten order ("hwc" or "chw"); columns are always
    (h, w, c) flatten order."""
    w = np.asarray(w_oihw, np.float32)
    cout, cin, kh, kw = w.shape
    ho, wo = h_in - kh + 1, w_in - kw + 1
    if row_order == "chw":
        dense = np.zeros((cin, h_in, w_in, ho, wo, cout), np.float32)
        for di in range(kh):
            for dj in range(kw):
                tap = np.transpose(w[:, :, di, dj])        # [cin, cout]
                for i in range(ho):
                    for j in range(wo):
                        dense[:, i + di, j + dj, i, j, :] = tap
    else:
        dense = np.zeros((h_in, w_in, cin, ho, wo, cout), np.float32)
        for di in range(kh):
            for dj in range(kw):
                tap = np.transpose(w[:, :, di, dj])        # [cin, cout]
                for i in range(ho):
                    for j in range(wo):
                        dense[i + di, j + dj, :, i, j, :] = tap
    return jnp.asarray(dense.reshape(h_in * w_in * cin, ho * wo * cout))


def _pad2d(a, rows, cols):
    return jnp.pad(a, ((0, rows - a.shape[0]), (0, cols - a.shape[1])))


def _pad1d(a, n):
    return jnp.pad(a, (0, n - a.shape[0]))


def build_kernel_params(params, eps):
    hi = jax.lax.Precision.HIGHEST   # one-time folds at full precision

    def bn(layer):
        scale = layer["gamma"] / jnp.sqrt(layer["rvar"] + eps)
        shift = layer["beta"] - layer["rmean"] * scale
        return scale, shift

    s1, t1 = bn(params["c1"]); s2, t2 = bn(params["c2"]); s3, t3 = bn(params["c3"])
    nf = params["c3"]["w"].shape[0]                      # num_filters (8)

    # W1 rows in CHW order (matches x_nchw.reshape(B, -1)); W2/W3 rows in HWC
    # order (matches the previous layer's output-column ordering).
    W1 = _conv_as_dense(params["c1"]["w"], 9, 9, row_order="chw")   # [486, 392]
    W2 = _conv_as_dense(params["c2"]["w"], 7, 7, row_order="hwc")   # [392, 200]
    W3 = _conv_as_dense(params["c3"]["w"], 5, 5, row_order="hwc")   # [200,  72]

    B1 = jnp.tile(params["c1"]["b"], 49)                 # conv1 bias, (h,w,c) order

    s1f, t1f = jnp.tile(s1, 49), jnp.tile(t1, 49)
    s2f, t2f = jnp.tile(s2, 25), jnp.tile(t2, 25)
    s3f, t3f = jnp.tile(s3, 9), jnp.tile(t3, 9)

    # Fold BN1 into conv2 and BN2 into conv3 (BN affine -> next linear op).
    B2 = jnp.tile(params["c2"]["b"], 25) + jnp.dot(t1f, W2, precision=hi)
    W2 = s1f[:, None] * W2
    B3 = jnp.tile(params["c3"]["b"], 9) + jnp.dot(t2f, W3, precision=hi)
    W3 = s2f[:, None] * W3

    # Collapse the activation-free Linear(72,1024) @ Linear(1024,1) head (exact),
    # permute rows from PyTorch's CHW flatten order to our HWC order, fold BN3 in.
    w_eff = jnp.dot(params["fc1_w"], params["fc2_w"], precision=hi)[:, 0]       # [72] CHW
    b_eff = jnp.dot(params["fc1_b"], params["fc2_w"], precision=hi)[0] + params["fc2_b"][0]
    w_hwc = jnp.transpose(w_eff.reshape(nf, 3, 3), (1, 2, 0)).reshape(nf * 9)   # [72] HWC
    WF = s3f * w_hwc
    BF = jnp.dot(t3f, w_hwc, precision=hi) + b_eff

    # Lane-pad N dims to multiples of 128 (and matching K rows / biases) so the
    # per-layer epilogues and the final reduce see full, unmasked vregs.
    # Padded columns stay exactly zero through bias + ReLU, so this is exact.
    W1 = _pad2d(W1, 486, 512)
    W2 = _pad2d(W2, 512, 256)
    W3 = _pad2d(W3, 256, 128)
    B1, B2, B3 = _pad1d(B1, 512), _pad1d(B2, 256), _pad1d(B3, 128)
    WF = _pad1d(WF, 128)

    return dict(
        W1=W1.astype(jnp.bfloat16), B1=B1[None, :].astype(jnp.float32),
        W2=W2.astype(jnp.bfloat16), B2=B2[None, :].astype(jnp.float32),
        W3=W3.astype(jnp.bfloat16), B3=B3[None, :].astype(jnp.float32),
        WF=WF[None, :].astype(jnp.float32),
        BF=BF.reshape(1, 1).astype(jnp.float32),
    )


# --------------------------- params & reference -----------------------------

def init_params(key, num_bands=6, num_filters=8, nodes_hidden=1024):
    eps = 1e-5
    keys = iter(jax.random.split(key, 32))
    nxt = lambda: next(keys)

    def conv_layer(cin, cout):
        return dict(
            w=jax.random.normal(nxt(), (cout, cin, 3, 3), jnp.float32) * 0.1,
            b=jax.random.normal(nxt(), (cout,), jnp.float32) * 0.05,
            gamma=1.0 + 0.1 * jax.random.normal(nxt(), (cout,), jnp.float32),
            beta=0.1 * jax.random.normal(nxt(), (cout,), jnp.float32),
            rmean=0.1 * jax.random.normal(nxt(), (cout,), jnp.float32),
            rvar=jax.random.uniform(nxt(), (cout,), jnp.float32, 0.5, 1.5),
        )

    params = dict(
        c1=conv_layer(num_bands, num_filters),
        c2=conv_layer(num_filters, num_filters),
        c3=conv_layer(num_filters, num_filters),
        fc1_w=jax.random.normal(nxt(), (num_filters * 9, nodes_hidden), jnp.float32) * 0.05,
        fc1_b=0.05 * jax.random.normal(nxt(), (nodes_hidden,), jnp.float32),
        fc2_w=jax.random.normal(nxt(), (nodes_hidden, 1), jnp.float32) * 0.05,
        fc2_b=0.05 * jax.random.normal(nxt(), (1,), jnp.float32),
    )
    return params, eps


def reference_forward(x_nchw, params, eps):
    x = x_nchw
    for name in ("c1", "c2", "c3"):
        lyr = params[name]
        x = lax.conv_general_dilated(x, lyr["w"], (1, 1), "VALID",
                                     dimension_numbers=("NCHW", "OIHW", "NCHW"),
                                     precision=jax.lax.Precision.HIGHEST)
        x = jnp.maximum(x + lyr["b"][None, :, None, None], 0.0)
        x = (x - lyr["rmean"][None, :, None, None]) / jnp.sqrt(
            lyr["rvar"][None, :, None, None] + eps)
        x = x * lyr["gamma"][None, :, None, None] + lyr["beta"][None, :, None, None]
    feats = x.reshape(x.shape[0], -1)                      # PyTorch Flatten (C,H,W)
    h = jnp.dot(feats, params["fc1_w"], precision=jax.lax.Precision.HIGHEST) + params["fc1_b"]
    return jnp.dot(h, params["fc2_w"], precision=jax.lax.Precision.HIGHEST) + params["fc2_b"]


# ---------------------------------- main -------------------------------------

if __name__ == "__main__":
    key = jax.random.PRNGKey(0)
    pkey, xkey = jax.random.split(key)
    params, eps = init_params(pkey)

    B = 2
    x = jax.random.normal(xkey, (B, 6, 9, 9), jnp.float32)   # NCHW, like PyTorch

    kparams = build_kernel_params(params, eps)

    out = jax.block_until_ready(cnn_forward(x, kparams))
    assert out.shape == (B, 1)

    ref = reference_forward(x, params, eps)
    max_diff = float(jnp.max(jnp.abs(out - ref)))
    # bf16 single-pass MXU operands vs f32-HIGHEST reference.
    assert max_diff < 2e-2, f"mismatch vs reference: {max_diff}"

    print("KERNEL_OK")
</pallas_src>

<mosaic_0001>
module attributes {stable_mosaic.version = 11 : i64} {
  func.func @fused_cnn_kernel(%arg0: i32, %arg1: memref<8x486xbf16, #tpu.memory_space<vmem>>, %arg2: memref<486x512xbf16, #tpu.memory_space<vmem>>, %arg3: memref<1x512xf32, #tpu.memory_space<vmem>>, %arg4: memref<512x256xbf16, #tpu.memory_space<vmem>>, %arg5: memref<1x256xf32, #tpu.memory_space<vmem>>, %arg6: memref<256x128xbf16, #tpu.memory_space<vmem>>, %arg7: memref<1x128xf32, #tpu.memory_space<vmem>>, %arg8: memref<1x128xf32, #tpu.memory_space<vmem>>, %arg9: memref<1x1xf32, #tpu.memory_space<vmem>>, %arg10: memref<8x1xf32, #tpu.memory_space<vmem>>) attributes {dimension_semantics = [#tpu.dimension_semantics<parallel>], iteration_bounds = array<i64: 1>, scalar_prefetch = 0 : i64, scratch_operands = 0 : i64, tpu.core_type = #tpu.core_type<tc>, window_params = [{transform_indices = @transform_0, window_bounds = array<i64: 8, 486>}, {pipeline_mode = #tpu.pipeline_mode<synchronous>, transform_indices = @transform_1, window_bounds = array<i64: 486, 512>}, {pipeline_mode = #tpu.pipeline_mode<synchronous>, transform_indices = @transform_2, window_bounds = array<i64: 1, 512>}, {pipeline_mode = #tpu.pipeline_mode<synchronous>, transform_indices = @transform_3, window_bounds = array<i64: 512, 256>}, {pipeline_mode = #tpu.pipeline_mode<synchronous>, transform_indices = @transform_4, window_bounds = array<i64: 1, 256>}, {pipeline_mode = #tpu.pipeline_mode<synchronous>, transform_indices = @transform_5, window_bounds = array<i64: 256, 128>}, {pipeline_mode = #tpu.pipeline_mode<synchronous>, transform_indices = @transform_6, window_bounds = array<i64: 1, 128>}, {pipeline_mode = #tpu.pipeline_mode<synchronous>, transform_indices = @transform_7, window_bounds = array<i64: 1, 128>}, {pipeline_mode = #tpu.pipeline_mode<synchronous>, transform_indices = @transform_8, window_bounds = array<i64: 1, 1>}, {transform_indices = @transform_9, window_bounds = array<i64: 8, 1>}]} {
    %c0 = arith.constant 0 : index
    %c0_0 = arith.constant 0 : index
    %0 = vector.load %arg1[%c0, %c0_0] : memref<8x486xbf16, #tpu.memory_space<vmem>>, vector<8x486xbf16>
    %c0_1 = arith.constant 0 : index
    %c0_2 = arith.constant 0 : index
    %1 = vector.load %arg2[%c0_1, %c0_2] : memref<486x512xbf16, #tpu.memory_space<vmem>>, vector<486x512xbf16>
    %cst = arith.constant dense<0.000000e+00> : vector<8x512xf32>
    %2 = tpu.matmul %0, %1, %cst {dimension_numbers = #tpu.dot_dimension_numbers<[1], [0], [0], [1], [0, 0, 1, 1], [], []>} : vector<8x486xbf16>, vector<486x512xbf16>, vector<8x512xf32> -> vector<8x512xf32>
    %c0_3 = arith.constant 0 : index
    %c0_4 = arith.constant 0 : index
    %3 = vector.load %arg3[%c0_3, %c0_4] : memref<1x512xf32, #tpu.memory_space<vmem>>, vector<1x512xf32>
    %4 = vector.broadcast %3 : vector<1x512xf32> to vector<8x512xf32>
    %5 = arith.addf %2, %4 : vector<8x512xf32>
    %cst_5 = arith.constant 0.000000e+00 : f32
    %6 = vector.broadcast %cst_5 : f32 to vector<8x512xf32>
    %7 = arith.maximumf %5, %6 : vector<8x512xf32>
    %8 = arith.truncf %7 : vector<8x512xf32> to vector<8x512xbf16>
    %c0_6 = arith.constant 0 : index
    %c0_7 = arith.constant 0 : index
    %9 = vector.load %arg4[%c0_6, %c0_7] : memref<512x256xbf16, #tpu.memory_space<vmem>>, vector<512x256xbf16>
    %cst_8 = arith.constant dense<0.000000e+00> : vector<8x256xf32>
    %10 = tpu.matmul %8, %9, %cst_8 {dimension_numbers = #tpu.dot_dimension_numbers<[1], [0], [0], [1], [0, 0, 1, 1], [], []>} : vector<8x512xbf16>, vector<512x256xbf16>, vector<8x256xf32> -> vector<8x256xf32>
    %c0_9 = arith.constant 0 : index
    %c0_10 = arith.constant 0 : index
    %11 = vector.load %arg5[%c0_9, %c0_10] : memref<1x256xf32, #tpu.memory_space<vmem>>, vector<1x256xf32>
    %12 = vector.broadcast %11 : vector<1x256xf32> to vector<8x256xf32>
    %13 = arith.addf %10, %12 : vector<8x256xf32>
    %cst_11 = arith.constant 0.000000e+00 : f32
    %14 = vector.broadcast %cst_11 : f32 to vector<8x256xf32>
    %15 = arith.maximumf %13, %14 : vector<8x256xf32>
    %16 = arith.truncf %15 : vector<8x256xf32> to vector<8x256xbf16>
    %c0_12 = arith.constant 0 : index
    %c0_13 = arith.constant 0 : index
    %17 = vector.load %arg6[%c0_12, %c0_13] : memref<256x128xbf16, #tpu.memory_space<vmem>>, vector<256x128xbf16>
    %cst_14 = arith.constant dense<0.000000e+00> : vector<8x128xf32>
    %18 = tpu.matmul %16, %17, %cst_14 {dimension_numbers = #tpu.dot_dimension_numbers<[1], [0], [0], [1], [0, 0, 1, 1], [], []>} : vector<8x256xbf16>, vector<256x128xbf16>, vector<8x128xf32> -> vector<8x128xf32>
    %c0_15 = arith.constant 0 : index
    %c0_16 = arith.constant 0 : index
    %19 = vector.load %arg7[%c0_15, %c0_16] : memref<1x128xf32, #tpu.memory_space<vmem>>, vector<1x128xf32>
    %20 = vector.broadcast %19 : vector<1x128xf32> to vector<8x128xf32>
    %21 = arith.addf %18, %20 : vector<8x128xf32>
    %cst_17 = arith.constant 0.000000e+00 : f32
    %22 = vector.broadcast %cst_17 : f32 to vector<8x128xf32>
    %23 = arith.maximumf %21, %22 : vector<8x128xf32>
    %c0_18 = arith.constant 0 : index
    %c0_19 = arith.constant 0 : index
    %24 = vector.load %arg8[%c0_18, %c0_19] : memref<1x128xf32, #tpu.memory_space<vmem>>, vector<1x128xf32>
    %25 = vector.broadcast %24 : vector<1x128xf32> to vector<8x128xf32>
    %26 = arith.mulf %23, %25 : vector<8x128xf32>
    %cst_20 = arith.constant dense<0.000000e+00> : vector<8xf32>
    %27 = vector.multi_reduction <add>, %26, %cst_20 [1] : vector<8x128xf32> to vector<8xf32>
    %28 = vector.shape_cast %27 : vector<8xf32> to vector<8x1xf32>
    %c0_21 = arith.constant 0 : index
    %c0_22 = arith.constant 0 : index
    %29 = vector.load %arg9[%c0_21, %c0_22] : memref<1x1xf32, #tpu.memory_space<vmem>>, vector<1x1xf32>
    %30 = vector.broadcast %29 : vector<1x1xf32> to vector<8x1xf32>
    %31 = arith.addf %28, %30 : vector<8x1xf32>
    %c0_23 = arith.constant 0 : index
    %c0_24 = arith.constant 0 : index
    %32 = vector.load %arg10[%c0_23, %c0_24] : memref<8x1xf32, #tpu.memory_space<vmem>>, vector<8x1xf32>
    tpu.vector_store %arg10[%c0_23, %c0_24], %31 {strides = array<i32>} : memref<8x1xf32, #tpu.memory_space<vmem>>, vector<8x1xf32>,
    return
  }
  func.func @transform_0(%arg0: i32) -> (i32, i32) {
    %c0_i32 = arith.constant 0 : i32
    %c0_i32_0 = arith.constant 0 : i32
    return %arg0, %c0_i32 : i32, i32
  }
  func.func @transform_1(%arg0: i32) -> (i32, i32) {
    %c0_i32 = arith.constant 0 : i32
    %c0_i32_0 = arith.constant 0 : i32
    %c0_i32_1 = arith.constant 0 : i32
    return %c0_i32, %c0_i32_0 : i32, i32
  }
  func.func @transform_2(%arg0: i32) -> (i32, i32) {
    %c0_i32 = arith.constant 0 : i32
    %c0_i32_0 = arith.constant 0 : i32
    %c0_i32_1 = arith.constant 0 : i32
    return %c0_i32, %c0_i32_0 : i32, i32
  }
  func.func @transform_3(%arg0: i32) -> (i32, i32) {
    %c0_i32 = arith.constant 0 : i32
    %c0_i32_0 = arith.constant 0 : i32
    %c0_i32_1 = arith.constant 0 : i32
    return %c0_i32, %c0_i32_0 : i32, i32
  }
  func.func @transform_4(%arg0: i32) -> (i32, i32) {
    %c0_i32 = arith.constant 0 : i32
    %c0_i32_0 = arith.constant 0 : i32
    %c0_i32_1 = arith.constant 0 : i32
    return %c0_i32, %c0_i32_0 : i32, i32
  }
  func.func @transform_5(%arg0: i32) -> (i32, i32) {
    %c0_i32 = arith.constant 0 : i32
    %c0_i32_0 = arith.constant 0 : i32
    %c0_i32_1 = arith.constant 0 : i32
    return %c0_i32, %c0_i32_0 : i32, i32
  }
  func.func @transform_6(%arg0: i32) -> (i32, i32) {
    %c0_i32 = arith.constant 0 : i32
    %c0_i32_0 = arith.constant 0 : i32
    %c0_i32_1 = arith.constant 0 : i32
    return %c0_i32, %c0_i32_0 : i32, i32
  }
  func.func @transform_7(%arg0: i32) -> (i32, i32) {
    %c0_i32 = arith.constant 0 : i32
    %c0_i32_0 = arith.constant 0 : i32
    %c0_i32_1 = arith.constant 0 : i32
    return %c0_i32, %c0_i32_0 : i32, i32
  }
  func.func @transform_8(%arg0: i32) -> (i32, i32) {
    %c0_i32 = arith.constant 0 : i32
    %c0_i32_0 = arith.constant 0 : i32
    %c0_i32_1 = arith.constant 0 : i32
    return %c0_i32, %c0_i32_0 : i32, i32
  }
  func.func @transform_9(%arg0: i32) -> (i32, i32) {
    %c0_i32 = arith.constant 0 : i32
    %c0_i32_0 = arith.constant 0 : i32
    return %arg0, %c0_i32 : i32, i32
  }
}

</mosaic_0001>

<bundles_post_ra>
// kernel: tpu_custom_call.1
= control target key start
LH: loop header
LB: loop body
LE: loop exit
PB: predicated region body
PF: predicated region fallthrough
CT: control target
= control target key end

     0   :  { %s2552_s0 = inlined_call_operand.hbm [shape: bf16[8,486], index: 0, kind: input, shape index: {}]   ;;  %s2553_s1 = inlined_call_operand.hbm [shape: bf16[486,512], index: 1, kind: input, shape index: {}]   ;;  %s2554_s2 = inlined_call_operand.vmem [shape: f32[1,512], index: 2, kind: input, shape index: {}]   ;;  %s2555_s3 = inlined_call_operand.hbm [shape: bf16[512,256], index: 3, kind: input, shape index: {}]   ;;  %s2556_s4 = inlined_call_operand.vmem [shape: f32[1,256], index: 4, kind: input, shape index: {}]   ;;  %s2557_s5 = inlined_call_operand.hbm [shape: bf16[256,128], index: 5, kind: input, shape index: {}]   ;;  %s2558_s6 = inlined_call_operand.vmem [shape: f32[1,128], index: 6, kind: input, shape index: {}]   ;;  %s2559_s7 = inlined_call_operand.vmem [shape: f32[1,128], index: 7, kind: input, shape index: {}]   ;;  %s2560_s8 = inlined_call_operand.<no memory space> [shape: f32[1,1], index: 8, kind: input, shape index: {}]   ;;  %s2561_s9 = inlined_call_operand.vmem [shape: f32[8,1], index: 9, kind: output, shape index: {}]  }
   0x1   :  { %v14_v0 = vstv %s2560_s8 }
   0x2   :  { %15 = vst [vmem:[#allocation2] sm:$0x1] %v14_v0 }
   0x3   :  { %16 = vsyncpa [#allocation4], 0 }
   0x4   :  { %17 = vsyncpa [#allocation6], 0 }
   0x5   :  { %18 = vsyncpa [#allocation9], 0  ;;  %s2388_s11 = smov [#allocation5]   ;;  %s2294_s15 = scalar_lea.hbm %s2553_s1, 15616 }
   0x6   :  { %s34_s12 = sshll.u32 %s2388_s11, 4  ;;  %p2295_p0 = scmp.ne.s32.totalorder %s2553_s1, %s2294_s15  ;;  %s35_s12 = int_to_ptr.vmem [resolvable:$true] %s34_s12 }
   0x7   :  { %p2298_p1 = scmp.lt.u32.totalorder %s2294_s15, %s2553_s1 }
   0x9   :  { %p2300_p2 = pnand %p2298_p1, %p2295_p0 }
   0xb   :  { %2303 = shalt.err (!%p2300_p2)
}
   0xc   :  { %s2304_s8 = scalar_lea.vmem %s35_s12, 15616  ;;  %p2309_p4 = scmp.lt.s32.totalorder %s35_s12, %s35_s12 }
   0xd   :  { %p2305_p3 = scmp.ne.s32.totalorder %s35_s12, %s2304_s8  ;;  %p2310_p5 = scmp.lt.s32.totalorder %s2304_s8, %s2304_s8 }
   0xf   :  { %p2311_p6 = por %p2310_p5, %p2309_p4 }
  0x11   :  { %p2312_p7 = pnand %p2311_p6, %p2305_p3 }
  0x13   :  { %2315 = shalt.err (!%p2312_p7)
}
  0x14   :  { %s2389_s20 = smov 256   ;;  %s2390_s21 = smov 16  }
  0x15   :  { %40 = dma.hbm_to_vmem [thread:$0]  %s2553_s1, 15616, %s35_s12, [#allocation6], %s2389_s20, %s2389_s20, %s2390_s21  }
  0x16   :  { %s2391_s24 = smov [#allocation3]   ;;  %s2392_s26 = smov [#allocation7]  }
  0x17   :  { %s25_s25 = sshll.u32 %s2391_s24, 4  ;;  %s48_s27 = sshll.u32 %s2392_s26, 4  ;;  %s26_s25 = int_to_ptr.vmem [resolvable:$true] %s25_s25  ;;  %s49_s27 = int_to_ptr.vmem [resolvable:$true] %s48_s27 }
  0x18   :  { %s2316_s30 = scalar_lea.hbm %s2552_s0, 256 }
  0x19   :  { %p2317_p8 = scmp.ne.s32.totalorder %s2552_s0, %s2316_s30  ;;  %p2320_p9 = scmp.lt.u32.totalorder %s2316_s30, %s2552_s0 }
  0x1b   :  { %p2322_p10 = pnand %p2320_p9, %p2317_p8 }
  0x1d   :  { %2325 = shalt.err (!%p2322_p10)
}
  0x1e   :  { %s2326_s1 = scalar_lea.vmem %s26_s25, 256  ;;  %p2331_p12 = scmp.lt.s32.totalorder %s26_s25, %s26_s25 }
  0x1f   :  { %p2327_p11 = scmp.ne.s32.totalorder %s26_s25, %s2326_s1  ;;  %p2332_p13 = scmp.lt.s32.totalorder %s2326_s1, %s2326_s1 }
  0x21   :  { %p2333_p0 = por %p2332_p13, %p2331_p12 }
  0x23   :  { %p2334_p1 = pnand %p2333_p0, %p2327_p11 }
  0x25   :  { %2337 = shalt.err (!%p2334_p1)
}
  0x26   :  { %28 = dma.hbm_to_vmem [thread:$0]  %s2552_s0, 256, %s26_s25, [#allocation4]  }
  0x27   :  { %s2338_s18 = scalar_lea.hbm %s2555_s3, 8192 }
  0x28   :  { %p2339_p2 = scmp.ne.s32.totalorder %s2555_s3, %s2338_s18  ;;  %p2342_p3 = scmp.lt.u32.totalorder %s2338_s18, %s2555_s3 }
  0x2a   :  { %p2344_p4 = pnand %p2342_p3, %p2339_p2 }
  0x2c   :  { %2347 = shalt.err (!%p2344_p4)
}
  0x2d   :  { %s2348_s22 = scalar_lea.vmem %s49_s27, 8192  ;;  %p2353_p6 = scmp.lt.s32.totalorder %s49_s27, %s49_s27 }
  0x2e   :  { %p2349_p5 = scmp.ne.s32.totalorder %s49_s27, %s2348_s22  ;;  %p2354_p7 = scmp.lt.s32.totalorder %s2348_s22, %s2348_s22 }
  0x30   :  { %p2355_p8 = por %p2354_p7, %p2353_p6 }
  0x32   :  { %p2356_p9 = pnand %p2355_p8, %p2349_p5 }
  0x34   :  { %2359 = shalt.err (!%p2356_p9)
}
  0x35   :  { %s2393_s0 = smov 128   ;;  %s2394_s23 = smov 8  }
  0x36   :  { %54 = dma.hbm_to_vmem [thread:$0]  %s2555_s3, 8192, %s49_s27, [#allocation6], %s2393_s0, %s2393_s0, %s2394_s23  }
  0x37   :  { %s2395_s26 = smov [#allocation8]   ;;  %s2360_s10 = scalar_lea.hbm %s2557_s5, 2048 }
  0x38   :  { %s62_s28 = sshll.u32 %s2395_s26, 4  ;;  %p2361_p10 = scmp.ne.s32.totalorder %s2557_s5, %s2360_s10  ;;  %s63_s28 = int_to_ptr.vmem [resolvable:$true] %s62_s28 }
  0x39   :  { %p2364_p11 = scmp.lt.u32.totalorder %s2360_s10, %s2557_s5 }
  0x3b   :  { %p2366_p12 = pnand %p2364_p11, %p2361_p10 }
  0x3d   :  { %2369 = shalt.err (!%p2366_p12)
}
  0x3e   :  { %s2370_s12 = scalar_lea.vmem %s63_s28, 2048  ;;  %p2375_p0 = scmp.lt.s32.totalorder %s63_s28, %s63_s28 }
  0x3f   :  { %p2371_p13 = scmp.ne.s32.totalorder %s63_s28, %s2370_s12  ;;  %p2376_p1 = scmp.lt.s32.totalorder %s2370_s12, %s2370_s12 }
  0x41   :  { %p2377_p2 = por %p2376_p1, %p2375_p0 }
  0x43   :  { %p2378_p3 = pnand %p2377_p2, %p2371_p13 }
  0x45   :  { %2381 = shalt.err (!%p2378_p3)
}
  0x46   :  { %s2396_s3 = smov 64   ;;  %s2397_s27 = smov 4  }
  0x47   :  { %68 = dma.hbm_to_vmem [thread:$0]  %s2557_s5, 2048, %s63_s28, [#allocation9], %s2396_s3, %s2396_s3, %s2397_s27  }
  0x48   :  { %2382 = dma.done.wait [#allocation4], 256  }
  0x49   :  { %2383 = vsyncadd [#allocation4], 4294967040 }
  0x4a   :  { %2384 = dma.done.wait [#allocation6], 23808  }
  0x4b   :  { %2385 = vsyncadd [#allocation6], 4294943488 }
  0x4c   :  { %2386 = dma.done.wait [#allocation9], 2048  }
  0x4d   :  { %2387 = vsyncadd [#allocation9], 4294965248  ;;  %v1994_v1 = vld [vmem:[#allocation5 + $0x4] ss:$16 sps:$4 sm:$0xff]   ;;  %v1998_v3 = vld [vmem:[#allocation5] ss:$16 sps:$4 sm:$0xff]  }
  0x4e   :  { %v1996_v2 = vld [vmem:[#allocation5 + $0x204] ss:$16 sps:$4 sm:$0xff]   ;;  %874 = vmatprep.subr.bf16.mxu0 %v1994_v1  ;;  %v1999_v4 = vld [vmem:[#allocation5 + $0x200] ss:$16 sps:$4 sm:$0xff]   ;;  %v89_v44 = vld [vmem:[#allocation3 + $0x8] sm:$0xff]  ;;  %vm857_vm0 = vcmask 834560  }
  0x4f   :  { %915 = vmatprep.subr.bf16.mxu1 %v1996_v2  ;;  %v2000_v5 = vld [vmem:[#allocation5 + $0x24] ss:$16 sps:$4 sm:$0xff]   ;;  %875 = vmatpush1.bf16.msra.mxu0 %v1998_v3  ;;  %v2004_v7 = vld [vmem:[#allocation5 + $0x20] ss:$16 sps:$4 sm:$0xff]   ;;  %v2499_v46 = vcombine.high %v89_v44, %v89_v44  ;;  %vm861_vm1 = vcmask 1042432   ;;  %vm1722_vm2 = vcmask 7168  }
  0x50   :  { %916 = vmatpush1.bf16.msra.mxu1 %v1999_v4  ;;  %v2002_v6 = vld [vmem:[#allocation5 + $0x224] ss:$16 sps:$4 sm:$0xff]   ;;  %876 = vmatprep.subr.bf16.mxu0 %v2000_v5  ;;  %v2005_v8 = vld [vmem:[#allocation5 + $0x220] ss:$16 sps:$4 sm:$0xff]   ;;  %v2089_v4 = vld [vmem:[#allocation5 + $0xc] ss:$16 sps:$4 sm:$0xff]   ;;  %v2505_v5 = vcombine.low %v89_v44, %v89_v44 }
  0x51   :  { %917 = vmatprep.subr.bf16.mxu1 %v2002_v6  ;;  %v2006_v9 = vld [vmem:[#allocation5 + $0x44] ss:$16 sps:$4 sm:$0xff]   ;;  %v2010_v11 = vld [vmem:[#allocation5 + $0x40] ss:$16 sps:$4 sm:$0xff]   ;;  %1860 = vmatprep.mubr.msk.bf16.mxu1 %vm857_vm0, %v2499_v46  ;;  %v2087_v6 = vld [vmem:[#allocation5 + $0x8] ss:$16 sps:$4 sm:$0xff]  }
  0x52   :  { %v2008_v10 = vld [vmem:[#allocation5 + $0x244] ss:$16 sps:$4 sm:$0xff]   ;;  %v2011_v12 = vld [vmem:[#allocation5 + $0x240] ss:$16 sps:$4 sm:$0xff]   ;;  %v2128_v44 = vld [vmem:[#allocation5 + $0x18c] ss:$16 sps:$4 sm:$0xff]  }
  0x53   :  { %877 = vmatpush1.bf16.msra.mxu0 %v2004_v7  ;;  %v2012_v13 = vld [vmem:[#allocation5 + $0x64] ss:$16 sps:$4 sm:$0xff]   ;;  %v2016_v15 = vld [vmem:[#allocation5 + $0x60] ss:$16 sps:$4 sm:$0xff]  }
  0x54   :  { %918 = vmatpush1.bf16.msra.mxu1 %v2005_v8  ;;  %878 = vmatprep.subr.bf16.mxu0 %v2006_v9  ;;  %v2014_v14 = vld [vmem:[#allocation5 + $0x264] ss:$16 sps:$4 sm:$0xff]   ;;  %v2017_v16 = vld [vmem:[#allocation5 + $0x260] ss:$16 sps:$4 sm:$0xff]   ;;  %v2095_v8 = vld [vmem:[#allocation5 + $0x2c] ss:$16 sps:$4 sm:$0xff]  }
  0x55   :  { %919 = vmatprep.subr.bf16.mxu1 %v2008_v10  ;;  %v2018_v17 = vld [vmem:[#allocation5 + $0x84] ss:$16 sps:$4 sm:$0xff]   ;;  %v2022_v19 = vld [vmem:[#allocation5 + $0x80] ss:$16 sps:$4 sm:$0xff]   ;;  %v2093_v10 = vld [vmem:[#allocation5 + $0x28] ss:$16 sps:$4 sm:$0xff]  }
  0x56   :  { %v2020_v18 = vld [vmem:[#allocation5 + $0x284] ss:$16 sps:$4 sm:$0xff]   ;;  %v2023_v20 = vld [vmem:[#allocation5 + $0x280] ss:$16 sps:$4 sm:$0xff]  }
  0x57   :  { %879 = vmatpush1.bf16.msra.mxu0 %v2010_v11  ;;  %v2024_v21 = vld [vmem:[#allocation5 + $0xa4] ss:$16 sps:$4 sm:$0xff]   ;;  %v2028_v23 = vld [vmem:[#allocation5 + $0xa0] ss:$16 sps:$4 sm:$0xff]   ;;  %v2098_v11 = vld [vmem:[#allocation5 + $0x4c] ss:$16 sps:$4 sm:$0xff]  }
  0x58   :  { %920 = vmatpush1.bf16.msra.mxu1 %v2011_v12  ;;  %880 = vmatprep.subr.bf16.mxu0 %v2012_v13  ;;  %v2026_v22 = vld [vmem:[#allocation5 + $0x2a4] ss:$16 sps:$4 sm:$0xff]   ;;  %v2029_v24 = vld [vmem:[#allocation5 + $0x2a0] ss:$16 sps:$4 sm:$0xff]   ;;  %v2096_v12 = vld [vmem:[#allocation5 + $0x48] ss:$16 sps:$4 sm:$0xff]  }
  0x59   :  { %921 = vmatprep.subr.bf16.mxu1 %v2014_v14  ;;  %v2030_v25 = vld [vmem:[#allocation5 + $0xc4] ss:$16 sps:$4 sm:$0xff]   ;;  %v2034_v27 = vld [vmem:[#allocation5 + $0xc0] ss:$16 sps:$4 sm:$0xff]   ;;  %v2101_v13 = vld [vmem:[#allocation5 + $0x6c] ss:$16 sps:$4 sm:$0xff]  }
  0x5a   :  { %v2032_v26 = vld [vmem:[#allocation5 + $0x2c4] ss:$16 sps:$4 sm:$0xff]   ;;  %v2035_v28 = vld [vmem:[#allocation5 + $0x2c0] ss:$16 sps:$4 sm:$0xff]   ;;  %v2099_v14 = vld [vmem:[#allocation5 + $0x68] ss:$16 sps:$4 sm:$0xff]  }
  0x5b   :  { %881 = vmatpush1.bf16.msra.mxu0 %v2016_v15  ;;  %v2036_v29 = vld [vmem:[#allocation5 + $0xe4] ss:$16 sps:$4 sm:$0xff]   ;;  %v2040_v31 = vld [vmem:[#allocation5 + $0xe0] ss:$16 sps:$4 sm:$0xff]   ;;  %v2104_v15 = vld [vmem:[#allocation5 + $0x8c] ss:$16 sps:$4 sm:$0xff]  }
  0x5c   :  { %922 = vmatpush1.bf16.msra.mxu1 %v2017_v16  ;;  %882 = vmatprep.subr.bf16.mxu0 %v2018_v17  ;;  %v2038_v30 = vld [vmem:[#allocation5 + $0x2e4] ss:$16 sps:$4 sm:$0xff]   ;;  %v2041_v32 = vld [vmem:[#allocation5 + $0x2e0] ss:$16 sps:$4 sm:$0xff]   ;;  %v2102_v16 = vld [vmem:[#allocation5 + $0x88] ss:$16 sps:$4 sm:$0xff]  }
  0x5d   :  { %923 = vmatprep.subr.bf16.mxu1 %v2020_v18  ;;  %v2042_v33 = vld [vmem:[#allocation5 + $0x104] ss:$16 sps:$4 sm:$0xff]   ;;  %v2046_v35 = vld [vmem:[#allocation5 + $0x100] ss:$16 sps:$4 sm:$0xff]   ;;  %v2107_v17 = vld [vmem:[#allocation5 + $0xac] ss:$16 sps:$4 sm:$0xff]  }
  0x5e   :  { %v2044_v34 = vld [vmem:[#allocation5 + $0x304] ss:$16 sps:$4 sm:$0xff]   ;;  %v2047_v36 = vld [vmem:[#allocation5 + $0x300] ss:$16 sps:$4 sm:$0xff]   ;;  %v2105_v18 = vld [vmem:[#allocation5 + $0xa8] ss:$16 sps:$4 sm:$0xff]  }
  0x5f   :  { %883 = vmatpush1.bf16.msra.mxu0 %v2022_v19  ;;  %v2048_v37 = vld [vmem:[#allocation5 + $0x124] ss:$16 sps:$4 sm:$0xff]   ;;  %v2052_v39 = vld [vmem:[#allocation5 + $0x120] ss:$16 sps:$4 sm:$0xff]   ;;  %v2110_v19 = vld [vmem:[#allocation5 + $0xcc] ss:$16 sps:$4 sm:$0xff]  }
  0x60   :  { %924 = vmatpush1.bf16.msra.mxu1 %v2023_v20  ;;  %884 = vmatprep.subr.bf16.mxu0 %v2024_v21  ;;  %v2050_v38 = vld [vmem:[#allocation5 + $0x324] ss:$16 sps:$4 sm:$0xff]   ;;  %v2053_v40 = vld [vmem:[#allocation5 + $0x320] ss:$16 sps:$4 sm:$0xff]  }
  0x61   :  { %925 = vmatprep.subr.bf16.mxu1 %v2026_v22  ;;  %v2054_v41 = vld [vmem:[#allocation5 + $0x144] ss:$16 sps:$4 sm:$0xff]   ;;  %v2058_v43 = vld [vmem:[#allocation5 + $0x140] ss:$16 sps:$4 sm:$0xff]   ;;  %v2108_v22 = vld [vmem:[#allocation5 + $0xc8] ss:$16 sps:$4 sm:$0xff]  }
  0x62   :  { %v2056_v42 = vld [vmem:[#allocation5 + $0x344] ss:$16 sps:$4 sm:$0xff]   ;;  %v2059_v45 = vld [vmem:[#allocation5 + $0x340] ss:$16 sps:$4 sm:$0xff]  }
  0x63   :  { %885 = vmatpush1.bf16.msra.mxu0 %v2028_v23  ;;  %v2060_v47 = vld [vmem:[#allocation5 + $0x164] ss:$16 sps:$4 sm:$0xff]   ;;  %v2064_v51 = vld [vmem:[#allocation5 + $0x160] ss:$16 sps:$4 sm:$0xff]  }
  0x64   :  { %926 = vmatpush1.bf16.msra.mxu1 %v2029_v24  ;;  %886 = vmatprep.subr.bf16.mxu0 %v2030_v25  ;;  %v2062_v48 = vld [vmem:[#allocation5 + $0x364] ss:$16 sps:$4 sm:$0xff]   ;;  %v2065_v52 = vld [vmem:[#allocation5 + $0x360] ss:$16 sps:$4 sm:$0xff]   ;;  %v2113_v24 = vld [vmem:[#allocation5 + $0xec] ss:$16 sps:$4 sm:$0xff]  }
  0x65   :  { %927 = vmatprep.subr.bf16.mxu1 %v2032_v26  ;;  %v88_v49 = vld [vmem:[#allocation3] sm:$0xff]  ;;  %v210_v59 = vld [vmem:[#allocation5 + $0x3c0] sm:$0x77] }
  0x66   :  { %v1732_v50 = vcombine.high %v88_v49, %v88_v49  ;;  %v2066_v53 = vld [vmem:[#allocation5 + $0x184] ss:$16 sps:$4 sm:$0xff]   ;;  %v2070_v55 = vld [vmem:[#allocation5 + $0x180] ss:$16 sps:$4 sm:$0xff]   ;;  %v1856_v63 = vcombine.high %v210_v59, %v210_v59  ;;  %v1855_v0 = vcombine.low %v210_v59, %v210_v59  ;;  %v2508_v9 = vcombine.low %v88_v49, %v88_v49  ;;  %v2131_v49 = vld [vmem:[#allocation5 + $0x1ac] ss:$16 sps:$4 sm:$0xff]  }
  0x67   :  { %887 = vmatpush1.bf16.msra.mxu0 %v2034_v27  ;;  %v2068_v54 = vld [vmem:[#allocation5 + $0x384] ss:$16 sps:$4 sm:$0xff]   ;;  %v2071_v56 = vld [vmem:[#allocation5 + $0x380] ss:$16 sps:$4 sm:$0xff]   ;;  %v2111_v27 = vld [vmem:[#allocation5 + $0xe8] ss:$16 sps:$4 sm:$0xff]  }
  0x68   :  { %928 = vmatpush1.bf16.msra.mxu1 %v2035_v28  ;;  %888 = vmatprep.subr.bf16.mxu0 %v2036_v29  ;;  %v2072_v57 = vld [vmem:[#allocation5 + $0x1a4] ss:$16 sps:$4 sm:$0xff]   ;;  %v2076_v60 = vld [vmem:[#allocation5 + $0x1a0] ss:$16 sps:$4 sm:$0xff]   ;;  %v863_v3 = vsel %vm861_vm1, %v1855_v0, 0 }
  0x69   :  { %929 = vmatprep.subr.bf16.mxu1 %v2038_v30  ;;  %906 = vmatprep.mubr.bf16.mxu0 %v1732_v50  ;;  %v2074_v58 = vld [vmem:[#allocation5 + $0x3a4] ss:$16 sps:$4 sm:$0xff]   ;;  %v2077_v61 = vld [vmem:[#allocation5 + $0x3a0] ss:$16 sps:$4 sm:$0xff]   ;;  %v2116_v28 = vld [vmem:[#allocation5 + $0x10c] ss:$16 sps:$4 sm:$0xff]  }
  0x6a   :  { %v2078_v62 = vld [vmem:[#allocation5 + $0x1c4] ss:$16 sps:$4 sm:$0xff]   ;;  %v2081_v1 = vld [vmem:[#allocation5 + $0x1c0] ss:$16 sps:$4 sm:$0xff]   ;;  %v2138_v0 = vld [vmem:[#allocation5 + $0x208] ss:$16 sps:$4 sm:$0xff]  }
  0x6b   :  { %889 = vmatpush1.bf16.msra.mxu0 %v2040_v31  ;;  %v2085_v2 = vld [vmem:[#allocation5 + $0x1e4] ss:$16 sps:$4 sm:$0xff]   ;;  %v2090_v7 = vld [vmem:[#allocation5 + $0x1e0] ss:$16 sps:$4 sm:$0xff]   ;;  %v2114_v31 = vld [vmem:[#allocation5 + $0x108] ss:$16 sps:$4 sm:$0xff]  }
  0x6c   :  { %930 = vmatpush1.bf16.msra.mxu1 %v2041_v32  ;;  %890 = vmatprep.subr.bf16.mxu0 %v2042_v33  ;;  %v2182_v20 = vld [vmem:[#allocation7] ss:$8 sps:$4 sm:$0xff]   ;;  %v2184_v21 = vld [vmem:[#allocation7 + $0x4] ss:$8 sps:$4 sm:$0xff]   ;;  %v2187_v23 = vld [vmem:[#allocation7 + $0x14] ss:$8 sps:$4 sm:$0xff]  }
  0x6d   :  { %931 = vmatprep.subr.bf16.mxu1 %v2044_v34  ;;  %v2185_v25 = vld [vmem:[#allocation7 + $0x10] ss:$8 sps:$4 sm:$0xff]   ;;  %v2190_v26 = vld [vmem:[#allocation7 + $0x24] ss:$8 sps:$4 sm:$0xff]   ;;  %v2188_v29 = vld [vmem:[#allocation7 + $0x20] ss:$8 sps:$4 sm:$0xff]  }
  0x6e   :  { %v2193_v30 = vld [vmem:[#allocation7 + $0x34] ss:$8 sps:$4 sm:$0xff]   ;;  %v2191_v33 = vld [vmem:[#allocation7 + $0x30] ss:$8 sps:$4 sm:$0xff]   ;;  %v2196_v34 = vld [vmem:[#allocation7 + $0x44] ss:$8 sps:$4 sm:$0xff]  }
  0x6f   :  { %891 = vmatpush1.bf16.msra.mxu0 %v2046_v35  ;;  %v2119_v32 = vld [vmem:[#allocation5 + $0x12c] ss:$16 sps:$4 sm:$0xff]   ;;  %v2117_v35 = vld [vmem:[#allocation5 + $0x128] ss:$16 sps:$4 sm:$0xff]  }
  0x70   :  { %932 = vmatpush1.bf16.msra.mxu1 %v2047_v36  ;;  %892 = vmatprep.subr.bf16.mxu0 %v2048_v37  ;;  %v2122_v36 = vld [vmem:[#allocation5 + $0x14c] ss:$16 sps:$4 sm:$0xff]   ;;  %v2194_v37 = vld [vmem:[#allocation7 + $0x40] ss:$8 sps:$4 sm:$0xff]  }
  0x71   :  { %933 = vmatprep.subr.bf16.mxu1 %v2050_v38  ;;  %v2120_v38 = vld [vmem:[#allocation5 + $0x148] ss:$16 sps:$4 sm:$0xff]   ;;  %v2214_v59 = vld [vmem:[#allocation7 + $0xa4] ss:$8 sps:$4 sm:$0xff]  }
  0x73   :  { %893 = vmatpush1.bf16.msra.mxu0 %v2052_v39  ;;  %v2199_v39 = vld [vmem:[#allocation7 + $0x54] ss:$8 sps:$4 sm:$0xff]  }
  0x74   :  { %934 = vmatpush1.bf16.msra.mxu1 %v2053_v40  ;;  %894 = vmatprep.subr.bf16.mxu0 %v2054_v41  ;;  %v2125_v40 = vld [vmem:[#allocation5 + $0x16c] ss:$16 sps:$4 sm:$0xff]   ;;  %v2197_v41 = vld [vmem:[#allocation7 + $0x50] ss:$8 sps:$4 sm:$0xff]  }
  0x75   :  { %935 = vmatprep.subr.bf16.mxu1 %v2056_v42  ;;  %v2202_v42 = vld [vmem:[#allocation7 + $0x64] ss:$8 sps:$4 sm:$0xff]  }
  0x77   :  { %895 = vmatpush1.bf16.msra.mxu0 %v2058_v43  ;;  %v2123_v43 = vld [vmem:[#allocation5 + $0x168] ss:$16 sps:$4 sm:$0xff]  }
  0x78   :  { %936 = vmatpush1.bf16.msra.mxu1 %v2059_v45  ;;  %896 = vmatprep.subr.bf16.mxu0 %v2060_v47  ;;  %v2200_v45 = vld [vmem:[#allocation7 + $0x60] ss:$8 sps:$4 sm:$0xff]   ;;  %v2205_v47 = vld [vmem:[#allocation7 + $0x74] ss:$8 sps:$4 sm:$0xff]  }
  0x79   :  { %937 = vmatprep.subr.bf16.mxu1 %v2062_v48  ;;  %v2126_v48 = vld [vmem:[#allocation5 + $0x188] ss:$16 sps:$4 sm:$0xff]  }
  0x7b   :  { %897 = vmatpush1.bf16.msra.mxu0 %v2064_v51  ;;  %v2208_v51 = vld [vmem:[#allocation7 + $0x84] ss:$8 sps:$4 sm:$0xff]  }
  0x7c   :  { %938 = vmatpush1.bf16.msra.mxu1 %v2065_v52  ;;  %898 = vmatprep.subr.bf16.mxu0 %v2066_v53  ;;  %v2129_v52 = vld [vmem:[#allocation5 + $0x1a8] ss:$16 sps:$4 sm:$0xff]   ;;  %v2134_v53 = vld [vmem:[#allocation5 + $0x1cc] ss:$16 sps:$4 sm:$0xff]  }
  0x7d   :  { %939 = vmatprep.subr.bf16.mxu1 %v2068_v54  ;;  %v2206_v54 = vld [vmem:[#allocation7 + $0x80] ss:$8 sps:$4 sm:$0xff]  }
  0x7f   :  { %899 = vmatpush1.bf16.msra.mxu0 %v2070_v55  ;;  %v2211_v55 = vld [vmem:[#allocation7 + $0x94] ss:$8 sps:$4 sm:$0xff]  }
  0x80   :  { %940 = vmatpush1.bf16.msra.mxu1 %v2071_v56  ;;  %900 = vmatprep.subr.bf16.mxu0 %v2072_v57  ;;  %v2132_v56 = vld [vmem:[#allocation5 + $0x1c8] ss:$16 sps:$4 sm:$0xff]   ;;  %v2137_v57 = vld [vmem:[#allocation5 + $0x1ec] ss:$16 sps:$4 sm:$0xff]  }
  0x81   :  { %941 = vmatprep.subr.bf16.mxu1 %v2074_v58  ;;  %v2209_v58 = vld [vmem:[#allocation7 + $0x90] ss:$8 sps:$4 sm:$0xff]  }
  0x83   :  { %901 = vmatpush1.bf16.msra.mxu0 %v2076_v60  ;;  %v2135_v60 = vld [vmem:[#allocation5 + $0x1e8] ss:$16 sps:$4 sm:$0xff]  }
  0x84   :  { %942 = vmatpush1.bf16.msra.mxu1 %v2077_v61  ;;  %902 = vmatprep.subr.bf16.mxu0 %v2078_v62  ;;  %v2140_v61 = vld [vmem:[#allocation5 + $0x20c] ss:$16 sps:$4 sm:$0xff]   ;;  %v2212_v62 = vld [vmem:[#allocation7 + $0xa0] ss:$8 sps:$4 sm:$0xff]  }
  0x85   :  { %1859 = vmatprep.subr.msk.bf16.mxu1 %vm861_vm1, %v1856_v63  ;;  %v2217_v63 = vld [vmem:[#allocation7 + $0xb4] ss:$8 sps:$4 sm:$0xff]  }
  0x87   :  { %903 = vmatpush1.bf16.msra.mxu0 %v2081_v1  ;;  %v2143_v1 = vld [vmem:[#allocation5 + $0x22c] ss:$16 sps:$4 sm:$0xff]  }
  0x88   :  { %944 = vmatpush1.bf16.msra.mxu1 %v863_v3  ;;  %904 = vmatprep.subr.bf16.mxu0 %v2085_v2  ;;  %v2215_v2 = vld [vmem:[#allocation7 + $0xb0] ss:$8 sps:$4 sm:$0xff]   ;;  %v2220_v3 = vld [vmem:[#allocation7 + $0xc4] ss:$8 sps:$4 sm:$0xff]  }
  0x89   :  { %956 = vmatprep.subr.bf16.mxu1 %v2089_v4  ;;  %v2141_v4 = vld [vmem:[#allocation5 + $0x228] ss:$16 sps:$4 sm:$0xff]  }
  0x8b   :  { %948 = vmatmul.mubr.bf16.vlgmr.msra.gmra.mrb[0].mxu1 %v2505_v5  ;;  %905 = vmatpush1.bf16.msra.mxu0 %v2090_v7  ;;  %v2218_v7 = vld [vmem:[#allocation7 + $0xc0] ss:$8 sps:$4 sm:$0xff]  }
  0x8c   :  { %957 = vmatpush1.bf16.msra.mxu1 %v2087_v6  ;;  %988 = vmatprep.mubr.bf16.mxu1 %v1732_v50  ;;  %v2203_v50 = vld [vmem:[#allocation7 + $0x70] ss:$8 sps:$4 sm:$0xff]   ;;  %v2146_v6 = vld [vmem:[#allocation5 + $0x24c] ss:$16 sps:$4 sm:$0xff]  }
  0x8d   :  { %958 = vmatprep.subr.bf16.mxu1 %v2095_v8  ;;  %1442 = vmatprep.subr.bf16.mxu0 %v2184_v21  ;;  %v2144_v8 = vld [vmem:[#allocation5 + $0x248] ss:$16 sps:$4 sm:$0xff]  }
  0x8e   :  { %907 = vmatmul.mubr.bf16.vlgmr.msra.gmra.mrb[0].mxu0 %v2508_v9  ;;  %v2224_v21 = vld [vmem:[#allocation7 + $0xe0] ss:$8 sps:$4 sm:$0xff]  }
  0x8f   :  { %1443 = vmatpush1.bf16.msra.mxu0 %v2182_v20  ;;  %v2159_v20 = vld [vmem:[#allocation5 + $0x2e8] ss:$16 sps:$4 sm:$0xff]  }
  0x90   :  { %959 = vmatpush1.bf16.msra.mxu1 %v2093_v10  ;;  %1444 = vmatprep.subr.bf16.mxu0 %v2187_v23  ;;  %v2149_v10 = vld [vmem:[#allocation5 + $0x26c] ss:$16 sps:$4 sm:$0xff]  }
  0x91   :  { %960 = vmatprep.subr.bf16.mxu1 %v2098_v11  ;;  %v2147_v11 = vld [vmem:[#allocation5 + $0x268] ss:$16 sps:$4 sm:$0xff]   ;;  %v2229_v23 = vld [vmem:[#allocation7 + $0xf4] ss:$8 sps:$4 sm:$0xff]  }
  0x93   :  { %1445 = vmatpush1.bf16.msra.mxu0 %v2185_v25  ;;  %v2227_v25 = vld [vmem:[#allocation7 + $0xf0] ss:$8 sps:$4 sm:$0xff]  }
  0x94   :  { %961 = vmatpush1.bf16.msra.mxu1 %v2096_v12  ;;  %1446 = vmatprep.subr.bf16.mxu0 %v2190_v26  ;;  %v2152_v12 = vld [vmem:[#allocation5 + $0x28c] ss:$16 sps:$4 sm:$0xff]  }
  0x95   :  { %962 = vmatprep.subr.bf16.mxu1 %v2101_v13  ;;  %v2155_v13 = vld [vmem:[#allocation5 + $0x2ac] ss:$16 sps:$4 sm:$0xff]  }
  0x96   :  { %v2167_v26 = vld [vmem:[#allocation5 + $0x32c] ss:$16 sps:$4 sm:$0xff]  }
  0x97   :  { %1447 = vmatpush1.bf16.msra.mxu0 %v2188_v29  ;;  %v2232_v29 = vld [vmem:[#allocation7 + $0x104] ss:$8 sps:$4 sm:$0xff]  }
  0x98   :  { %963 = vmatpush1.bf16.msra.mxu1 %v2099_v14  ;;  %1448 = vmatprep.subr.bf16.mxu0 %v2193_v30  ;;  %v2158_v14 = vld [vmem:[#allocation5 + $0x2cc] ss:$16 sps:$4 sm:$0xff]   ;;  %v2168_v30 = vld [vmem:[#allocation5 + $0x348] ss:$16 sps:$4 sm:$0xff]  }
  0x99   :  { %964 = vmatprep.subr.bf16.mxu1 %v2104_v15  ;;  %v2223_v15 = vld [vmem:[#allocation7 + $0xd4] ss:$8 sps:$4 sm:$0xff]  }
  0x9b   :  { %1449 = vmatpush1.bf16.msra.mxu0 %v2191_v33  ;;  %v2176_v33 = vld [vmem:[#allocation5 + $0x38c] ss:$16 sps:$4 sm:$0xff]  }
  0x9c   :  { %965 = vmatpush1.bf16.msra.mxu1 %v2102_v16  ;;  %1450 = vmatprep.subr.bf16.mxu0 %v2196_v34  ;;  %v2156_v16 = vld [vmem:[#allocation5 + $0x2c8] ss:$16 sps:$4 sm:$0xff]  }
  0x9d   :  { %966 = vmatprep.subr.bf16.mxu1 %v2107_v17  ;;  %v2221_v17 = vld [vmem:[#allocation7 + $0xd0] ss:$8 sps:$4 sm:$0xff]  }
  0x9e   :  { %v2174_v34 = vld [vmem:[#allocation5 + $0x388] ss:$16 sps:$4 sm:$0xff]  }
  0x9f   :  { %1451 = vmatpush1.bf16.msra.mxu0 %v2194_v37  ;;  %v2177_v37 = vld [vmem:[#allocation5 + $0x3a8] ss:$16 sps:$4 sm:$0xff]  }
  0xa0   :  { %967 = vmatpush1.bf16.msra.mxu1 %v2105_v18  ;;  %1452 = vmatprep.subr.bf16.mxu0 %v2199_v39  ;;  %v2161_v18 = vld [vmem:[#allocation5 + $0x2ec] ss:$16 sps:$4 sm:$0xff]  }
  0xa1   :  { %968 = vmatprep.subr.bf16.mxu1 %v2110_v19  ;;  %v2226_v19 = vld [vmem:[#allocation7 + $0xe4] ss:$8 sps:$4 sm:$0xff]  }
  0xa3   :  { %1453 = vmatpush1.bf16.msra.mxu0 %v2197_v41  ;;  %v214_v41 = vlaneseq }
  0xa4   :  { %969 = vmatpush1.bf16.msra.mxu1 %v2108_v22  ;;  %1454 = vmatprep.subr.bf16.mxu0 %v2202_v42  ;;  %v2164_v22 = vld [vmem:[#allocation5 + $0x30c] ss:$16 sps:$4 sm:$0xff]  }
  0xa5   :  { %970 = vmatprep.subr.bf16.mxu1 %v2113_v24  ;;  %v2162_v24 = vld [vmem:[#allocation5 + $0x308] ss:$16 sps:$4 sm:$0xff]   ;;  %v2517_v42 = vshrl.u32 %v214_v41, 7  ;;  %v2277_v41 = vld [vmem:[#allocation7 + $0x1f4] ss:$8 sps:$4 sm:$0xff]  }
  0xa7   :  { %1455 = vmatpush1.bf16.msra.mxu0 %v2200_v45  ;;  %v220_v45 = vsub.s32 1, %v2517_v42 }
  0xa8   :  { %971 = vmatpush1.bf16.msra.mxu1 %v2111_v27  ;;  %1456 = vmatprep.subr.bf16.mxu0 %v2205_v47  ;;  %v2165_v27 = vld [vmem:[#allocation5 + $0x328] ss:$16 sps:$4 sm:$0xff]  }
  0xa9   :  { %972 = vmatprep.subr.bf16.mxu1 %v2116_v28  ;;  %v2170_v28 = vld [vmem:[#allocation5 + $0x34c] ss:$16 sps:$4 sm:$0xff]  }
  0xab   :  { %1457 = vmatpush1.bf16.msra.mxu0 %v2203_v50 }
  0xac   :  { %973 = vmatpush1.bf16.msra.mxu1 %v2114_v31  ;;  %1458 = vmatprep.subr.bf16.mxu0 %v2208_v51  ;;  %v2173_v31 = vld [vmem:[#allocation5 + $0x36c] ss:$16 sps:$4 sm:$0xff]  }
  0xad   :  { %974 = vmatprep.subr.bf16.mxu1 %v2119_v32  ;;  %v2171_v32 = vld [vmem:[#allocation5 + $0x368] ss:$16 sps:$4 sm:$0xff]  }
  0xaf   :  { %1459 = vmatpush1.bf16.msra.mxu0 %v2206_v54 }
  0xb0   :  { %975 = vmatpush1.bf16.msra.mxu1 %v2117_v35  ;;  %1460 = vmatprep.subr.bf16.mxu0 %v2211_v55  ;;  %v2179_v35 = vld [vmem:[#allocation5 + $0x3ac] ss:$16 sps:$4 sm:$0xff]   ;;  %v2278_v55 = vld [vmem:[#allocation8 + $0x40] sm:$0xff]  }
  0xb1   :  { %976 = vmatprep.subr.bf16.mxu1 %v2122_v36  ;;  %v211_v36 = vld [vmem:[#allocation5 + $0x3c8] sm:$0x77] }
  0xb2   :  { %v1857_v39 = vcombine.low %v211_v36, %v211_v36 }
  0xb3   :  { %1461 = vmatpush1.bf16.msra.mxu0 %v2209_v58 }
  0xb4   :  { %977 = vmatpush1.bf16.msra.mxu1 %v2120_v38  ;;  %1462 = vmatprep.subr.bf16.mxu0 %v2214_v59  ;;  %v1858_v38 = vcombine.high %v211_v36, %v211_v36  ;;  %v2266_v36 = vld [vmem:[#allocation7 + $0x1c0] ss:$8 sps:$4 sm:$0xff]  }
  0xb5   :  { %978 = vmatprep.subr.bf16.mxu1 %v2125_v40  ;;  %v869_v40 = vsel %vm861_vm1, %v1857_v39, 0  ;;  %v2274_v39 = vld [vmem:[#allocation7 + $0x1e4] ss:$8 sps:$4 sm:$0xff]  }
  0xb7   :  { %1463 = vmatpush1.bf16.msra.mxu0 %v2212_v62 }
  0xb8   :  { %979 = vmatpush1.bf16.msra.mxu1 %v2123_v43  ;;  %1464 = vmatprep.subr.bf16.mxu0 %v2217_v63  ;;  %v216_v43 = vsub.s32 0, %v2517_v42  ;;  %v2281_v63 = vld [vmem:[#allocation8 + $0x8] sm:$0xff]  }
  0xb9   :  { %980 = vmatprep.subr.bf16.mxu1 %v2128_v44  ;;  %v2523_v44 = vld [vmem:[%s2554_s2] sm:$0xf] }
  0xbb   :  { %1465 = vmatpush1.bf16.msra.mxu0 %v2215_v2 }
  0xbc   :  { %981 = vmatpush1.bf16.msra.mxu1 %v2126_v48  ;;  %1466 = vmatprep.subr.bf16.mxu0 %v2220_v3 }
  0xbd   :  { %982 = vmatprep.subr.bf16.mxu1 %v2131_v49  ;;  %v217_v49 = vrot.slane %v2523_v44, %v216_v43 }
  0xbf   :  { %1467 = vmatpush1.bf16.msra.mxu0 %v2218_v7 }
  0xc0   :  { %983 = vmatpush1.bf16.msra.mxu1 %v2129_v52  ;;  %1468 = vmatprep.subr.bf16.mxu0 %v2223_v15  ;;  %v2241_v15 = vld [vmem:[#allocation7 + $0x134] ss:$8 sps:$4 sm:$0xff]  }
  0xc1   :  { %984 = vmatprep.subr.bf16.mxu1 %v2134_v53 }
  0xc3   :  { %1469 = vmatpush1.bf16.msra.mxu0 %v2221_v17  ;;  %v2239_v17 = vld [vmem:[#allocation7 + $0x130] ss:$8 sps:$4 sm:$0xff]  }
  0xc4   :  { %985 = vmatpush1.bf16.msra.mxu1 %v2132_v56  ;;  %1470 = vmatprep.subr.bf16.mxu0 %v2226_v19  ;;  %v2279_v56 = vld [vmem:[#allocation8] sm:$0xff]  }
  0xc5   :  { %986 = vmatprep.subr.bf16.mxu1 %v2137_v57  ;;  %v2280_v57 = vld [vmem:[#allocation8 + $0x48] sm:$0xff]  }
  0xc6   :  { %v2244_v19 = vld [vmem:[#allocation7 + $0x144] ss:$8 sps:$4 sm:$0xff]  }
  0xc7   :  { %1471 = vmatpush1.bf16.msra.mxu0 %v2224_v21  ;;  %v2247_v21 = vld [vmem:[#allocation7 + $0x154] ss:$8 sps:$4 sm:$0xff]  }
  0xc8   :  { %987 = vmatpush1.bf16.msra.mxu1 %v2135_v60  ;;  %1472 = vmatprep.subr.bf16.mxu0 %v2229_v23  ;;  %v2250_v23 = vld [vmem:[#allocation7 + $0x164] ss:$8 sps:$4 sm:$0xff]  }
  0xc9   :  { %997 = vmatprep.subr.bf16.mxu1 %v2140_v61 }
  0xcb   :  { %989 = vmatmul.mubr.bf16.vlgmr.msra.gmra.mrb[4].mxu1 %v2508_v9  ;;  %v2150_v9 = vld [vmem:[#allocation5 + $0x288] ss:$16 sps:$4 sm:$0xff]   ;;  %1473 = vmatpush1.bf16.msra.mxu0 %v2227_v25  ;;  %v2253_v25 = vld [vmem:[#allocation7 + $0x174] ss:$8 sps:$4 sm:$0xff]  }
  0xcc   :  { %998 = vmatpush1.bf16.msra.mxu1 %v2138_v0  ;;  %1862 = vmatprep.mubr.msk.bf16.mxu1 %vm857_vm0, %v2499_v46  ;;  %v2153_v46 = vld [vmem:[#allocation5 + $0x2a8] ss:$16 sps:$4 sm:$0xff]  }
  0xcd   :  { %999 = vmatprep.subr.bf16.mxu1 %v2143_v1  ;;  %1483 = vmatprep.subr.bf16.mxu0 %v2232_v29  ;;  %v2282_v1 = vld [vmem:[#allocation8 + $0x50] sm:$0xff]  }
  0xce   :  { %v2259_v29 = vld [vmem:[#allocation7 + $0x194] ss:$8 sps:$4 sm:$0xff]  }
  0xd0   :  { %1000 = vmatpush1.bf16.msra.mxu1 %v2141_v4  ;;  %v2230_v4 = vld [vmem:[#allocation7 + $0x100] ss:$8 sps:$4 sm:$0xff]  }
  0xd1   :  { %1001 = vmatprep.subr.bf16.mxu1 %v2146_v6  ;;  %v2283_v6 = vld [vmem:[#allocation8 + $0x10] sm:$0xff]  }
  0xd4   :  { %1002 = vmatpush1.bf16.msra.mxu1 %v2144_v8  ;;  %v2235_v8 = vld [vmem:[#allocation7 + $0x114] ss:$8 sps:$4 sm:$0xff]  }
  0xd5   :  { %1003 = vmatprep.subr.bf16.mxu1 %v2149_v10  ;;  %v2284_v10 = vld [vmem:[#allocation8 + $0x58] sm:$0xff]  }
  0xd8   :  { %1004 = vmatpush1.bf16.msra.mxu1 %v2147_v11  ;;  %v2233_v11 = vld [vmem:[#allocation7 + $0x110] ss:$8 sps:$4 sm:$0xff]  }
  0xd9   :  { %1005 = vmatprep.subr.bf16.mxu1 %v2152_v12  ;;  %v2285_v12 = vld [vmem:[#allocation8 + $0x18] sm:$0xff]  }
  0xdc   :  { %1006 = vmatpush1.bf16.msra.mxu1 %v2150_v9  ;;  %v2238_v9 = vld [vmem:[#allocation7 + $0x124] ss:$8 sps:$4 sm:$0xff]  }
  0xdd   :  { %1007 = vmatprep.subr.bf16.mxu1 %v2155_v13  ;;  %v2286_v13 = vld [vmem:[#allocation8 + $0x60] sm:$0xff]  }
  0xe0   :  { %1008 = vmatpush1.bf16.msra.mxu1 %v2153_v46  ;;  %v2236_v46 = vld [vmem:[#allocation7 + $0x120] ss:$8 sps:$4 sm:$0xff]  }
  0xe1   :  { %1009 = vmatprep.subr.bf16.mxu1 %v2158_v14  ;;  %v2287_v14 = vld [vmem:[#allocation8 + $0x20] sm:$0xff]  }
  0xe4   :  { %1010 = vmatpush1.bf16.msra.mxu1 %v2156_v16  ;;  %v2288_v16 = vld [vmem:[#allocation8 + $0x68] sm:$0xff]  }
  0xe5   :  { %1011 = vmatprep.subr.bf16.mxu1 %v2161_v18  ;;  %v2289_v18 = vld [vmem:[#allocation8 + $0x28] sm:$0xff]  }
  0xe8   :  { %1012 = vmatpush1.bf16.msra.mxu1 %v2159_v20  ;;  %v2242_v20 = vld [vmem:[#allocation7 + $0x140] ss:$8 sps:$4 sm:$0xff]  }
  0xe9   :  { %1013 = vmatprep.subr.bf16.mxu1 %v2164_v22  ;;  %v2245_v22 = vld [vmem:[#allocation7 + $0x150] ss:$8 sps:$4 sm:$0xff]  }
  0xec   :  { %1014 = vmatpush1.bf16.msra.mxu1 %v2162_v24  ;;  %v2248_v24 = vld [vmem:[#allocation7 + $0x160] ss:$8 sps:$4 sm:$0xff]  }
  0xed   :  { %1015 = vmatprep.subr.bf16.mxu1 %v2167_v26  ;;  %v2251_v26 = vld [vmem:[#allocation7 + $0x170] ss:$8 sps:$4 sm:$0xff]  }
  0xf0   :  { %1016 = vmatpush1.bf16.msra.mxu1 %v2165_v27  ;;  %v2256_v27 = vld [vmem:[#allocation7 + $0x184] ss:$8 sps:$4 sm:$0xff]  }
  0xf1   :  { %1017 = vmatprep.subr.bf16.mxu1 %v2170_v28  ;;  %v2254_v28 = vld [vmem:[#allocation7 + $0x180] ss:$8 sps:$4 sm:$0xff]  }
  0xf4   :  { %1018 = vmatpush1.bf16.msra.mxu1 %v2168_v30  ;;  %v2257_v30 = vld [vmem:[#allocation7 + $0x190] ss:$8 sps:$4 sm:$0xff]  }
  0xf5   :  { %1019 = vmatprep.subr.bf16.mxu1 %v2173_v31  ;;  %v2262_v31 = vld [vmem:[#allocation7 + $0x1a4] ss:$8 sps:$4 sm:$0xff]  }
  0xf8   :  { %1020 = vmatpush1.bf16.msra.mxu1 %v2171_v32  ;;  %v2260_v32 = vld [vmem:[#allocation7 + $0x1a0] ss:$8 sps:$4 sm:$0xff]  }
  0xf9   :  { %1021 = vmatprep.subr.bf16.mxu1 %v2176_v33  ;;  %v2265_v33 = vld [vmem:[#allocation7 + $0x1b4] ss:$8 sps:$4 sm:$0xff]  }
  0xfc   :  { %1022 = vmatpush1.bf16.msra.mxu1 %v2174_v34  ;;  %v2263_v34 = vld [vmem:[#allocation7 + $0x1b0] ss:$8 sps:$4 sm:$0xff]  }
  0xfd   :  { %1023 = vmatprep.subr.bf16.mxu1 %v2179_v35  ;;  %v2268_v35 = vld [vmem:[#allocation7 + $0x1c4] ss:$8 sps:$4 sm:$0xff]  }
 0x100   :  { %1024 = vmatpush1.bf16.msra.mxu1 %v2177_v37  ;;  %v2271_v37 = vld [vmem:[#allocation7 + $0x1d4] ss:$8 sps:$4 sm:$0xff]  }
 0x101   :  { %1861 = vmatprep.subr.msk.bf16.mxu1 %vm861_vm1, %v1858_v38  ;;  %v2269_v38 = vld [vmem:[#allocation7 + $0x1d0] ss:$8 sps:$4 sm:$0xff]  }
 0x104   :  { %1026 = vmatpush1.bf16.msra.mxu1 %v869_v40  ;;  %v2272_v40 = vld [vmem:[#allocation7 + $0x1e0] ss:$8 sps:$4 sm:$0xff]  }
 0x105   :  { %1946 = vmatprep.subr.bf16.mxu1 %v2278_v55 }
 0x107   :  { %1030 = vmatmul.mubr.bf16.vlgmr.msra.gmra.mrb[4].mxu1 %v2505_v5  ;;  %v221_v5 = vrot.slane %v2523_v44, %v220_v45 }
 0x108   :  { %1947 = vmatpush3.bf16.msra.mxu1 %v2279_v56 }
 0x109   :  { %1948 = vmatprep.subr.bf16.mxu1 %v2280_v57 }
 0x10c   :  { %1949 = vmatpush3.bf16.msra.mxu1 %v2281_v63  ;;  %v2292_v63 = vld [vmem:[#allocation8 + $0x78] sm:$0xff]  }
 0x10d   :  { %1950 = vmatprep.subr.bf16.mxu1 %v2282_v1 }
 0x110   :  { %1951 = vmatpush3.bf16.msra.mxu1 %v2283_v6 }
 0x111   :  { %1952 = vmatprep.subr.bf16.mxu1 %v2284_v10 }
 0x114   :  { %1953 = vmatpush3.bf16.msra.mxu1 %v2285_v12 }
 0x115   :  { %1954 = vmatprep.subr.bf16.mxu1 %v2286_v13 }
 0x118   :  { %1955 = vmatpush3.bf16.msra.mxu1 %v2287_v14 }
 0x119   :  { %1956 = vmatprep.subr.bf16.mxu1 %v2288_v16 }
 0x11c   :  { %1957 = vmatpush3.bf16.msra.mxu1 %v2289_v18 }
 0x15e   :  { %v949_v47 = vpop.f32.mrb[0].mxu1 }
 0x15f   :  { %v951_v48 = vpop.f32.mrb[1].mxu1 }
 0x160   :  { %v953_v50 = vpop.f32.mrb[2].mxu1 }
 0x161   :  { %v954_v51 = vpop.f32.mrb[3].mxu1  ;;  %v908_v52 = vpop.f32.mrb[0].mxu0 }
 0x162   :  { %v909_v53 = vadd.f32 %v908_v52, %v217_v49  ;;  %v910_v54 = vpop.f32.mrb[1].mxu0  ;;  %v228_v49 = vsub.s32 3, %v2517_v42 }
 0x163   :  { %v911_v58 = vadd.f32 %v910_v54, %v221_v5  ;;  %v912_v59 = vpop.f32.mrb[2].mxu0 }
 0x164   :  { %v950_v60 = vadd.f32 %v949_v47, %v909_v53  ;;  %v913_v61 = vpop.f32.mrb[3].mxu0  ;;  %v2275_v47 = vld [vmem:[#allocation7 + $0x1f0] ss:$8 sps:$4 sm:$0xff]   ;;  %v229_v5 = vrot.slane %v2523_v44, %v228_v49 }
 0x165   :  { %v952_v62 = vadd.f32 %v951_v48, %v911_v58  ;;  %v224_v48 = vsub.s32 2, %v2517_v42  ;;  %v2290_v61 = vld [vmem:[#allocation8 + $0x70] sm:$0xff]  }
 0x166   :  { %v1038_v0 = vmax.f32 %v950_v60, 0.0  ;;  %1958 = vmatprep.subr.bf16.mxu1 %v2290_v61 }
 0x167   :  { %v1039_v2 = vmax.f32 %v952_v62, 0.0  ;;  %v225_v50 = vrot.slane %v2523_v44, %v224_v48  ;;  %v2291_v62 = vld [vmem:[#allocation8 + $0x30] sm:$0xff]   ;;  %v1110_v44 = vld [vmem:[%s2556_s4] sm:$0x3] }
 0x168   :  { %v1042_v7 = vpack.c.bf16 %v1038_v0, %v1038_v0  ;;  %1959 = vmatpush3.bf16.msra.mxu1 %v2291_v62  ;;  %v2293_v0 = vld [vmem:[#allocation8 + $0x38] sm:$0xff]   ;;  %v1115_v1 = vrot.slane %v1110_v44, %v216_v43 }
 0x169   :  { %v1043_v3 = vpack.c.bf16 %v1039_v2, %v1039_v2  ;;  %1960 = vmatprep.subr.bf16.mxu1 %v2292_v63  ;;  %v1119_v2 = vrot.slane %v1110_v44, %v220_v45  ;;  %v1927_v43 = vld [vmem:[%s2558_s6] ss:$0 sm:$0xff] }
 0x16b   :  { %1474 = vmatprep.mubr.bf16.mxu0 %v1043_v3 }
 0x16c   :  { %1475 = vmatmul.mubr.bf16.vlgmr.msra.gmra.mrb[4].mxu0 %v1042_v7  ;;  %1961 = vmatpush3.bf16.msra.mxu1 %v2293_v0 }
 0x16d   :  { %1484 = vmatpush1.bf16.msra.mxu0 %v2230_v4 }
 0x16e   :  { %1485 = vmatprep.subr.bf16.mxu0 %v2235_v8 }
 0x171   :  { %1486 = vmatpush1.bf16.msra.mxu0 %v2233_v11 }
 0x172   :  { %1487 = vmatprep.subr.bf16.mxu0 %v2238_v9 }
 0x175   :  { %1488 = vmatpush1.bf16.msra.mxu0 %v2236_v46 }
 0x176   :  { %1489 = vmatprep.subr.bf16.mxu0 %v2241_v15 }
 0x179   :  { %1490 = vmatpush1.bf16.msra.mxu0 %v2239_v17  ;;  %v1944_v17 = vld [vmem:[%s2559_s7] ss:$0 sm:$0xff] }
 0x17a   :  { %1491 = vmatprep.subr.bf16.mxu0 %v2244_v19 }
 0x17d   :  { %1492 = vmatpush1.bf16.msra.mxu0 %v2242_v20  ;;  %v1945_v20 = vld [vmem:[#allocation2] ss:$0 sm:$0xff] }
 0x17e   :  { %1493 = vmatprep.subr.bf16.mxu0 %v2247_v21 }
 0x181   :  { %1494 = vmatpush1.bf16.msra.mxu0 %v2245_v22 }
 0x182   :  { %1495 = vmatprep.subr.bf16.mxu0 %v2250_v23 }
 0x185   :  { %1496 = vmatpush1.bf16.msra.mxu0 %v2248_v24 }
 0x186   :  { %1497 = vmatprep.subr.bf16.mxu0 %v2253_v25 }
 0x189   :  { %1498 = vmatpush1.bf16.msra.mxu0 %v2251_v26 }
 0x18a   :  { %1499 = vmatprep.subr.bf16.mxu0 %v2256_v27 }
 0x18d   :  { %1500 = vmatpush1.bf16.msra.mxu0 %v2254_v28 }
 0x18e   :  { %1501 = vmatprep.subr.bf16.mxu0 %v2259_v29 }
 0x191   :  { %1502 = vmatpush1.bf16.msra.mxu0 %v2257_v30 }
 0x192   :  { %1503 = vmatprep.subr.bf16.mxu0 %v2262_v31 }
 0x195   :  { %1504 = vmatpush1.bf16.msra.mxu0 %v2260_v32 }
 0x196   :  { %1505 = vmatprep.subr.bf16.mxu0 %v2265_v33 }
 0x199   :  { %1506 = vmatpush1.bf16.msra.mxu0 %v2263_v34 }
 0x19a   :  { %1507 = vmatprep.subr.bf16.mxu0 %v2268_v35 }
 0x19d   :  { %1508 = vmatpush1.bf16.msra.mxu0 %v2266_v36 }
 0x19e   :  { %1509 = vmatprep.subr.bf16.mxu0 %v2271_v37 }
 0x1a1   :  { %1510 = vmatpush1.bf16.msra.mxu0 %v2269_v38 }
 0x1a2   :  { %1511 = vmatprep.subr.bf16.mxu0 %v2274_v39 }
 0x1a5   :  { %1512 = vmatpush1.bf16.msra.mxu0 %v2272_v40 }
 0x1a6   :  { %1513 = vmatprep.subr.bf16.mxu0 %v2277_v41 }
 0x1a9   :  { %1514 = vmatpush1.bf16.msra.mxu0 %v2275_v47 }
 0x1da   :  { %v1031_v51 = vpop.f32.mrb[4].mxu1 }
 0x1db   :  { %v1972_v52 = vadd.f32 %v1031_v51, %v225_v50  ;;  %v1033_v53 = vpop.f32.mrb[5].mxu1 }
 0x1dc   :  { %v1973_v54 = vadd.f32 %v1033_v53, %v229_v5  ;;  %v1035_v55 = vpop.f32.mrb[6].mxu1 }
 0x1dd   :  { %v1040_v56 = vmax.f32 %v1972_v52, 0.0  ;;  %v1036_v57 = vpop.f32.mrb[7].mxu1 }
 0x1de   :  { %v1041_v58 = vmax.f32 %v1973_v54, 0.0 }
 0x1df   :  { %v1044_v60 = vpack.c.bf16 %v1040_v56, %v1040_v56 }
 0x1e0   :  { %v1045_v59 = vpack.c.bf16 %v1041_v58, %v1041_v58 }
 0x1e2   :  { %1515 = vmatprep.mubr.bf16.mxu0 %v1045_v59 }
 0x1e3   :  { %1516 = vmatmul.mubr.bf16.vlgmr.msra.gmra.mrb[4].mxu0 %v1044_v60 }
 0x2b6   :  { %v1517_v3 = vpop.f32.mrb[4].mxu0 }
 0x2b7   :  { %v1974_v4 = vadd.f32 %v1517_v3, %v1115_v1  ;;  %v1519_v6 = vpop.f32.mrb[5].mxu0 }
 0x2b8   :  { %v1975_v7 = vadd.f32 %v1519_v6, %v1119_v2  ;;  %v1521_v8 = vpop.f32.mrb[6].mxu0 }
 0x2b9   :  { %v1524_v10 = vmax.f32 %v1974_v4, 0.0  ;;  %v1522_v11 = vpop.f32.mrb[7].mxu0 }
 0x2ba   :  { %v1525_v12 = vmax.f32 %v1975_v7, 0.0 }
 0x2bb   :  { %v1526_v13 = vpack.c.bf16 %v1524_v10, %v1524_v10 }
 0x2bc   :  { %v1527_v9 = vpack.c.bf16 %v1525_v12, %v1525_v12 }
 0x2be   :  { %1695 = vmatprep.mubr.bf16.mxu1 %v1527_v9 }
 0x2bf   :  { %1696 = vmatmul.mubr.bf16.vlgmr.msra.gmra.mrb[8].mxu1 %v1526_v13 }
 0x392   :  { %v1962_v46 = vpop.f32.mrb[8].mxu1 }
 0x393   :  { %v1963_v14 = vpop.f32.mrb[9].mxu1 }
 0x394   :  { %v1964_v42 = vadd.f32 %v1963_v14, %v1962_v46  ;;  %v1965_v45 = vpop.f32.mrb[10].mxu1 }
 0x395   :  { %v1966_v15 = vpop.f32.mrb[11].mxu1 }
 0x396   :  { %v1698_v16 = vadd.f32 %v1964_v42, %v1927_v43 }
 0x398   :  { %v1703_v18 = vmax.f32 %v1698_v16, 0.0 }
 0x39a   :  { %v1711_v19 = vmul.f32 %v1944_v17, %v1703_v18 }
 0x39c   :  { %1712 = vadd.xlane.f32.xlu0 %v1711_v19 }
 0x429   :  { %v1713_v21 = vpop.xlane.xlu0 %1712 }
 0x42a   :  { %v1721_v22 = vadd.f32 %v1945_v20, %v1713_v21 }
 0x42c   :  { %1723 = vst.msk [vmem:[%s2561_s9] sm:$0xff] %vm1722_vm2, %v1721_v22 }
 0x42d   :  { %1728 = vsyncpa [#allocation4], 1 }
 0x42e   :  { %1729 = vsyncpa [#allocation6], 1 }
 0x42f   :  { %1730 = vsyncpa [#allocation9], 1 }

</bundles_post_ra>
